<compile_context>
chip_gen: v6e
topology: v6e:2x2x1
jax: 0.10.0
libtpu: 0.0.40
codegen_flags: <defaults>
</compile_context>

<pallas_src>
import jax
import jax.numpy as jnp
from jax.experimental import pallas as pl
from jax.experimental.pallas import tpu as pltpu


def basic_transformer_kernel(ids_ref, embed_ref, w_ref, bw_ref, bclf_ref,
                             out_ref, x_scr):
    B = out_ref.shape[0]
    BT, D = x_scr.shape
    T = BT // B

    # ---- Embedding lookup: scalar-indexed row gather (ids live in SMEM). ----
    for i in range(BT):                       # BT is static -> fully unrolled
        x_scr[pl.ds(i, 1), :] = embed_ref[pl.ds(ids_ref[i], 1), :]
    x2d = x_scr[...]                                              # (BT, D)

    # ---- One lane-dense matmul against the packed (D, 4D) weight slab. ----
    # Columns: [0,D) = W_q^T * 1/sqrt(D), [D,2D) = W_k^T, [2D,3D) = W_v^T,
    #          [3D,4D) = W_lin^T (only used after attention; the extra 32
    #          output lanes of this matmul are simply ignored — same single
    #          MXU pass either way, and the operand tile stays unmasked).
    w_all = w_ref[...]                                            # (D, 4D)
    proj = jnp.dot(x2d, w_all, preferred_element_type=jnp.float32)  # (BT, 4D)

    # ---- Per-batch attention on flat 2-D tiles (B static -> unrolled). ----
    ys = []
    for b in range(B):
        r0 = b * T
        qb = proj[r0:r0 + T, 0 * D:1 * D]      # (T, D), already 1/sqrt(D) scaled
        kb = proj[r0:r0 + T, 1 * D:2 * D]      # (T, D)
        vb = proj[r0:r0 + T, 2 * D:3 * D]      # (T, D)
        # s[i, j] = q_i . k_j  (contract on D; trans-B form, no transposes)
        s = jax.lax.dot_general(qb, kb, (((1,), (1,)), ((), ())),
                                preferred_element_type=jnp.float32)  # (T, T)
        m = jnp.max(s, axis=-1, keepdims=True)
        p = jnp.exp(s - m)
        p = p / jnp.sum(p, axis=-1, keepdims=True)     # softmax over keys
        ys.append(jnp.dot(p, vb, preferred_element_type=jnp.float32))  # (T, D)
    y2d = jnp.concatenate(ys, axis=0)                             # (BT, D)

    # ---- Linear(dim, dim) + ReLU on flat rows. ----
    bw = bw_ref[...]                                              # (2, D)
    y2d = jnp.dot(y2d, w_all[:, 3 * D:4 * D],
                  preferred_element_type=jnp.float32) + bw[0:1, :]
    y2d = jnp.maximum(y2d, 0.0)

    # ---- Mean over timesteps (per batch), then Linear(dim, 1) + sigmoid. ----
    ym = jnp.concatenate(
        [jnp.mean(y2d[b * T:(b + 1) * T, :], axis=0, keepdims=True)
         for b in range(B)], axis=0)                              # (B, D)
    # Width-1 classifier as VPU multiply + lane reduce (no masked MXU pass).
    logits = jnp.sum(ym * bw[1:2, :], axis=-1, keepdims=True)     # (B, 1)
    logits = logits + bclf_ref[0, 0]
    out_ref[...] = 1.0 / (1.0 + jnp.exp(-logits))


def pack_params(params):
    """One-time repack of the module parameters into kernel-friendly layouts.

    Call this once and reuse the result; nothing here belongs on the hot path.
    """
    V, D = params['embed'].shape
    embed = params['embed'].astype(jnp.float32)
    # Pad the vocab axis to a sublane multiple; padded rows are never indexed
    # (all token ids < V), so the row gather is unaffected.
    V_pad = ((V + 7) // 8) * 8
    if V_pad != V:
        embed = jnp.pad(embed, ((0, V_pad - V), (0, 0)))

    scale = 1.0 / jnp.sqrt(jnp.float32(D))
    # (D, 4D) lane-dense slab: [W_q^T * scale | W_k^T | W_v^T | W_lin^T].
    w_pack = jnp.concatenate([params['W_q'].T * scale,
                              params['W_k'].T,
                              params['W_v'].T,
                              params['W_lin'].T], axis=1)
    # (2, D): row 0 = linear bias, row 1 = classifier weight row.
    bw_pack = jnp.concatenate([params['b_lin'].reshape(1, D),
                               params['W_clf'].reshape(1, D)], axis=0)
    return {
        'embed': embed,
        'w_pack': w_pack.astype(jnp.float32),
        'bw_pack': bw_pack.astype(jnp.float32),
        'b_clf': params['b_clf'].reshape(1, 1).astype(jnp.float32),
    }


@jax.jit
def basic_transformer_forward(token_ids, packed):
    """token_ids: (B, T) int32 in [0, num_embeddings]. Returns (B, 1) float32."""
    B, T = token_ids.shape
    D = packed['embed'].shape[1]
    ids = token_ids.reshape(B * T).astype(jnp.int32)

    vmem = pl.BlockSpec(memory_space=pltpu.MemorySpace.VMEM)
    smem = pl.BlockSpec(memory_space=pltpu.MemorySpace.SMEM)

    return pl.pallas_call(
        basic_transformer_kernel,
        out_shape=jax.ShapeDtypeStruct((B, 1), jnp.float32),
        in_specs=[smem, vmem, vmem, vmem, smem],
        out_specs=vmem,
        scratch_shapes=[pltpu.VMEM((B * T, D), jnp.float32)],
    )(ids, packed['embed'], packed['w_pack'], packed['bw_pack'],
      packed['b_clf'])


def reference_forward(token_ids, params):
    """Pure-JAX reference mirroring the PyTorch forward exactly (for checking)."""
    x = params['embed'][token_ids].astype(jnp.float32)            # (B, T, D)
    x = jnp.transpose(x, (0, 2, 1))                               # (B, D, T)
    q = jnp.einsum('de,bet->bdt', params['W_q'], x)
    k = jnp.einsum('de,bet->bdt', params['W_k'], x)
    v = jnp.einsum('de,bet->bdt', params['W_v'], x)
    dim = x.shape[1]
    s = jnp.einsum('bdi,bdj->bij', q, k) / jnp.sqrt(jnp.float32(dim))
    w = jax.nn.softmax(s, axis=-1)                                # softmax over keys
    y = jnp.einsum('bij,bdj->bdi', w, v)                          # (B, D, T)
    y = jnp.transpose(y, (0, 2, 1))                               # (B, T, D)
    y = y @ params['W_lin'].T + params['b_lin']
    y = jnp.transpose(y, (0, 2, 1))                               # (B, D, T)
    y = jnp.maximum(y, 0.0)
    y = jnp.mean(y, axis=2)                                       # (B, D)
    y = y @ params['W_clf'].T + params['b_clf']
    return jax.nn.sigmoid(y)                                      # (B, 1)


def make_params(key, dim, num_embeddings):
    ks = jax.random.split(key, 8)
    bound = 1.0 / jnp.sqrt(jnp.float32(dim))
    return {
        # nn.Embedding default init: N(0, 1); table has num_embeddings + 1 rows.
        'embed': jax.random.normal(ks[0], (num_embeddings + 1, dim), jnp.float32),
        # torch.rand -> uniform [0, 1)
        'W_q': jax.random.uniform(ks[1], (dim, dim), jnp.float32),
        'W_k': jax.random.uniform(ks[2], (dim, dim), jnp.float32),
        'W_v': jax.random.uniform(ks[3], (dim, dim), jnp.float32),
        # nn.Linear(dim, dim)
        'W_lin': jax.random.uniform(ks[4], (dim, dim), jnp.float32,
                                    minval=-bound, maxval=bound),
        'b_lin': jax.random.uniform(ks[5], (1, dim), jnp.float32,
                                    minval=-bound, maxval=bound),
        # nn.Linear(dim, 1)
        'W_clf': jax.random.uniform(ks[6], (1, dim), jnp.float32,
                                    minval=-bound, maxval=bound),
        'b_clf': jax.random.uniform(ks[7], (1, 1), jnp.float32,
                                    minval=-bound, maxval=bound),
    }


if __name__ == "__main__":
    B, T = 2, 8
    dim = 32                 # dim == embedding_dim (required by the reference math)
    num_embeddings = 16

    key = jax.random.PRNGKey(0)
    pkey, xkey = jax.random.split(key)
    params = make_params(pkey, dim, num_embeddings)
    packed = pack_params(params)          # hoisted one-time weight repack

    token_ids = jax.random.randint(xkey, (B, T), 0, num_embeddings + 1,
                                   dtype=jnp.int32)

    out = basic_transformer_forward(token_ids, packed)
    out = jax.block_until_ready(out)

    ref = jax.block_until_ready(reference_forward(token_ids, params))
    assert out.shape == (B, 1)
    assert jnp.allclose(out, ref, rtol=1e-4, atol=1e-5), (out, ref)

    print("KERNEL_OK")
</pallas_src>

<mosaic_0001>
module attributes {stable_mosaic.version = 11 : i64} {
  func.func @basic_transformer_kernel(%arg0: memref<16xi32, #tpu.memory_space<smem>>, %arg1: memref<24x32xf32, #tpu.memory_space<vmem>>, %arg2: memref<32x128xf32, #tpu.memory_space<vmem>>, %arg3: memref<2x32xf32, #tpu.memory_space<vmem>>, %arg4: memref<1x1xf32, #tpu.memory_space<smem>>, %arg5: memref<2x1xf32, #tpu.memory_space<vmem>>, %arg6: memref<16x32xf32, #tpu.memory_space<vmem>>) attributes {dimension_semantics = [], scalar_prefetch = 0 : i64, scratch_operands = 1 : i64, tpu.core_type = #tpu.core_type<tc>} {
    %c0 = arith.constant 0 : index
    %0 = memref.load %arg0[%c0] : memref<16xi32, #tpu.memory_space<smem>>
    %1 = arith.index_cast %0 : i32 to index
    %c0_0 = arith.constant 0 : index
    %2 = vector.load %arg1[%1, %c0_0] : memref<24x32xf32, #tpu.memory_space<vmem>>, vector<1x32xf32>
    %c0_1 = arith.constant 0 : index
    %c0_2 = arith.constant 0 : index
    %3 = vector.load %arg6[%c0_1, %c0_2] : memref<16x32xf32, #tpu.memory_space<vmem>>, vector<1x32xf32>
    tpu.vector_store %arg6[%c0_1, %c0_2], %2 {strides = array<i32>} : memref<16x32xf32, #tpu.memory_space<vmem>>, vector<1x32xf32>,
    %c1 = arith.constant 1 : index
    %4 = memref.load %arg0[%c1] : memref<16xi32, #tpu.memory_space<smem>>
    %5 = arith.index_cast %4 : i32 to index
    %c0_3 = arith.constant 0 : index
    %6 = vector.load %arg1[%5, %c0_3] : memref<24x32xf32, #tpu.memory_space<vmem>>, vector<1x32xf32>
    %c1_4 = arith.constant 1 : index
    %c0_5 = arith.constant 0 : index
    %7 = vector.load %arg6[%c1_4, %c0_5] : memref<16x32xf32, #tpu.memory_space<vmem>>, vector<1x32xf32>
    tpu.vector_store %arg6[%c1_4, %c0_5], %6 {strides = array<i32>} : memref<16x32xf32, #tpu.memory_space<vmem>>, vector<1x32xf32>,
    %c2 = arith.constant 2 : index
    %8 = memref.load %arg0[%c2] : memref<16xi32, #tpu.memory_space<smem>>
    %9 = arith.index_cast %8 : i32 to index
    %c0_6 = arith.constant 0 : index
    %10 = vector.load %arg1[%9, %c0_6] : memref<24x32xf32, #tpu.memory_space<vmem>>, vector<1x32xf32>
    %c2_7 = arith.constant 2 : index
    %c0_8 = arith.constant 0 : index
    %11 = vector.load %arg6[%c2_7, %c0_8] : memref<16x32xf32, #tpu.memory_space<vmem>>, vector<1x32xf32>
    tpu.vector_store %arg6[%c2_7, %c0_8], %10 {strides = array<i32>} : memref<16x32xf32, #tpu.memory_space<vmem>>, vector<1x32xf32>,
    %c3 = arith.constant 3 : index
    %12 = memref.load %arg0[%c3] : memref<16xi32, #tpu.memory_space<smem>>
    %13 = arith.index_cast %12 : i32 to index
    %c0_9 = arith.constant 0 : index
    %14 = vector.load %arg1[%13, %c0_9] : memref<24x32xf32, #tpu.memory_space<vmem>>, vector<1x32xf32>
    %c3_10 = arith.constant 3 : index
    %c0_11 = arith.constant 0 : index
    %15 = vector.load %arg6[%c3_10, %c0_11] : memref<16x32xf32, #tpu.memory_space<vmem>>, vector<1x32xf32>
    tpu.vector_store %arg6[%c3_10, %c0_11], %14 {strides = array<i32>} : memref<16x32xf32, #tpu.memory_space<vmem>>, vector<1x32xf32>,
    %c4 = arith.constant 4 : index
    %16 = memref.load %arg0[%c4] : memref<16xi32, #tpu.memory_space<smem>>
    %17 = arith.index_cast %16 : i32 to index
    %c0_12 = arith.constant 0 : index
    %18 = vector.load %arg1[%17, %c0_12] : memref<24x32xf32, #tpu.memory_space<vmem>>, vector<1x32xf32>
    %c4_13 = arith.constant 4 : index
    %c0_14 = arith.constant 0 : index
    %19 = vector.load %arg6[%c4_13, %c0_14] : memref<16x32xf32, #tpu.memory_space<vmem>>, vector<1x32xf32>
    tpu.vector_store %arg6[%c4_13, %c0_14], %18 {strides = array<i32>} : memref<16x32xf32, #tpu.memory_space<vmem>>, vector<1x32xf32>,
    %c5 = arith.constant 5 : index
    %20 = memref.load %arg0[%c5] : memref<16xi32, #tpu.memory_space<smem>>
    %21 = arith.index_cast %20 : i32 to index
    %c0_15 = arith.constant 0 : index
    %22 = vector.load %arg1[%21, %c0_15] : memref<24x32xf32, #tpu.memory_space<vmem>>, vector<1x32xf32>
    %c5_16 = arith.constant 5 : index
    %c0_17 = arith.constant 0 : index
    %23 = vector.load %arg6[%c5_16, %c0_17] : memref<16x32xf32, #tpu.memory_space<vmem>>, vector<1x32xf32>
    tpu.vector_store %arg6[%c5_16, %c0_17], %22 {strides = array<i32>} : memref<16x32xf32, #tpu.memory_space<vmem>>, vector<1x32xf32>,
    %c6 = arith.constant 6 : index
    %24 = memref.load %arg0[%c6] : memref<16xi32, #tpu.memory_space<smem>>
    %25 = arith.index_cast %24 : i32 to index
    %c0_18 = arith.constant 0 : index
    %26 = vector.load %arg1[%25, %c0_18] : memref<24x32xf32, #tpu.memory_space<vmem>>, vector<1x32xf32>
    %c6_19 = arith.constant 6 : index
    %c0_20 = arith.constant 0 : index
    %27 = vector.load %arg6[%c6_19, %c0_20] : memref<16x32xf32, #tpu.memory_space<vmem>>, vector<1x32xf32>
    tpu.vector_store %arg6[%c6_19, %c0_20], %26 {strides = array<i32>} : memref<16x32xf32, #tpu.memory_space<vmem>>, vector<1x32xf32>,
    %c7 = arith.constant 7 : index
    %28 = memref.load %arg0[%c7] : memref<16xi32, #tpu.memory_space<smem>>
    %29 = arith.index_cast %28 : i32 to index
    %c0_21 = arith.constant 0 : index
    %30 = vector.load %arg1[%29, %c0_21] : memref<24x32xf32, #tpu.memory_space<vmem>>, vector<1x32xf32>
    %c7_22 = arith.constant 7 : index
    %c0_23 = arith.constant 0 : index
    %31 = vector.load %arg6[%c7_22, %c0_23] : memref<16x32xf32, #tpu.memory_space<vmem>>, vector<1x32xf32>
    tpu.vector_store %arg6[%c7_22, %c0_23], %30 {strides = array<i32>} : memref<16x32xf32, #tpu.memory_space<vmem>>, vector<1x32xf32>,
    %c8 = arith.constant 8 : index
    %32 = memref.load %arg0[%c8] : memref<16xi32, #tpu.memory_space<smem>>
    %33 = arith.index_cast %32 : i32 to index
    %c0_24 = arith.constant 0 : index
    %34 = vector.load %arg1[%33, %c0_24] : memref<24x32xf32, #tpu.memory_space<vmem>>, vector<1x32xf32>
    %c8_25 = arith.constant 8 : index
    %c0_26 = arith.constant 0 : index
    %35 = vector.load %arg6[%c8_25, %c0_26] : memref<16x32xf32, #tpu.memory_space<vmem>>, vector<1x32xf32>
    tpu.vector_store %arg6[%c8_25, %c0_26], %34 {strides = array<i32>} : memref<16x32xf32, #tpu.memory_space<vmem>>, vector<1x32xf32>,
    %c9 = arith.constant 9 : index
    %36 = memref.load %arg0[%c9] : memref<16xi32, #tpu.memory_space<smem>>
    %37 = arith.index_cast %36 : i32 to index
    %c0_27 = arith.constant 0 : index
    %38 = vector.load %arg1[%37, %c0_27] : memref<24x32xf32, #tpu.memory_space<vmem>>, vector<1x32xf32>
    %c9_28 = arith.constant 9 : index
    %c0_29 = arith.constant 0 : index
    %39 = vector.load %arg6[%c9_28, %c0_29] : memref<16x32xf32, #tpu.memory_space<vmem>>, vector<1x32xf32>
    tpu.vector_store %arg6[%c9_28, %c0_29], %38 {strides = array<i32>} : memref<16x32xf32, #tpu.memory_space<vmem>>, vector<1x32xf32>,
    %c10 = arith.constant 10 : index
    %40 = memref.load %arg0[%c10] : memref<16xi32, #tpu.memory_space<smem>>
    %41 = arith.index_cast %40 : i32 to index
    %c0_30 = arith.constant 0 : index
    %42 = vector.load %arg1[%41, %c0_30] : memref<24x32xf32, #tpu.memory_space<vmem>>, vector<1x32xf32>
    %c10_31 = arith.constant 10 : index
    %c0_32 = arith.constant 0 : index
    %43 = vector.load %arg6[%c10_31, %c0_32] : memref<16x32xf32, #tpu.memory_space<vmem>>, vector<1x32xf32>
    tpu.vector_store %arg6[%c10_31, %c0_32], %42 {strides = array<i32>} : memref<16x32xf32, #tpu.memory_space<vmem>>, vector<1x32xf32>,
    %c11 = arith.constant 11 : index
    %44 = memref.load %arg0[%c11] : memref<16xi32, #tpu.memory_space<smem>>
    %45 = arith.index_cast %44 : i32 to index
    %c0_33 = arith.constant 0 : index
    %46 = vector.load %arg1[%45, %c0_33] : memref<24x32xf32, #tpu.memory_space<vmem>>, vector<1x32xf32>
    %c11_34 = arith.constant 11 : index
    %c0_35 = arith.constant 0 : index
    %47 = vector.load %arg6[%c11_34, %c0_35] : memref<16x32xf32, #tpu.memory_space<vmem>>, vector<1x32xf32>
    tpu.vector_store %arg6[%c11_34, %c0_35], %46 {strides = array<i32>} : memref<16x32xf32, #tpu.memory_space<vmem>>, vector<1x32xf32>,
    %c12 = arith.constant 12 : index
    %48 = memref.load %arg0[%c12] : memref<16xi32, #tpu.memory_space<smem>>
    %49 = arith.index_cast %48 : i32 to index
    %c0_36 = arith.constant 0 : index
    %50 = vector.load %arg1[%49, %c0_36] : memref<24x32xf32, #tpu.memory_space<vmem>>, vector<1x32xf32>
    %c12_37 = arith.constant 12 : index
    %c0_38 = arith.constant 0 : index
    %51 = vector.load %arg6[%c12_37, %c0_38] : memref<16x32xf32, #tpu.memory_space<vmem>>, vector<1x32xf32>
    tpu.vector_store %arg6[%c12_37, %c0_38], %50 {strides = array<i32>} : memref<16x32xf32, #tpu.memory_space<vmem>>, vector<1x32xf32>,
    %c13 = arith.constant 13 : index
    %52 = memref.load %arg0[%c13] : memref<16xi32, #tpu.memory_space<smem>>
    %53 = arith.index_cast %52 : i32 to index
    %c0_39 = arith.constant 0 : index
    %54 = vector.load %arg1[%53, %c0_39] : memref<24x32xf32, #tpu.memory_space<vmem>>, vector<1x32xf32>
    %c13_40 = arith.constant 13 : index
    %c0_41 = arith.constant 0 : index
    %55 = vector.load %arg6[%c13_40, %c0_41] : memref<16x32xf32, #tpu.memory_space<vmem>>, vector<1x32xf32>
    tpu.vector_store %arg6[%c13_40, %c0_41], %54 {strides = array<i32>} : memref<16x32xf32, #tpu.memory_space<vmem>>, vector<1x32xf32>,
    %c14 = arith.constant 14 : index
    %56 = memref.load %arg0[%c14] : memref<16xi32, #tpu.memory_space<smem>>
    %57 = arith.index_cast %56 : i32 to index
    %c0_42 = arith.constant 0 : index
    %58 = vector.load %arg1[%57, %c0_42] : memref<24x32xf32, #tpu.memory_space<vmem>>, vector<1x32xf32>
    %c14_43 = arith.constant 14 : index
    %c0_44 = arith.constant 0 : index
    %59 = vector.load %arg6[%c14_43, %c0_44] : memref<16x32xf32, #tpu.memory_space<vmem>>, vector<1x32xf32>
    tpu.vector_store %arg6[%c14_43, %c0_44], %58 {strides = array<i32>} : memref<16x32xf32, #tpu.memory_space<vmem>>, vector<1x32xf32>,
    %c15 = arith.constant 15 : index
    %60 = memref.load %arg0[%c15] : memref<16xi32, #tpu.memory_space<smem>>
    %61 = arith.index_cast %60 : i32 to index
    %c0_45 = arith.constant 0 : index
    %62 = vector.load %arg1[%61, %c0_45] : memref<24x32xf32, #tpu.memory_space<vmem>>, vector<1x32xf32>
    %c15_46 = arith.constant 15 : index
    %c0_47 = arith.constant 0 : index
    %63 = vector.load %arg6[%c15_46, %c0_47] : memref<16x32xf32, #tpu.memory_space<vmem>>, vector<1x32xf32>
    tpu.vector_store %arg6[%c15_46, %c0_47], %62 {strides = array<i32>} : memref<16x32xf32, #tpu.memory_space<vmem>>, vector<1x32xf32>,
    %c0_48 = arith.constant 0 : index
    %c0_49 = arith.constant 0 : index
    %64 = vector.load %arg6[%c0_48, %c0_49] : memref<16x32xf32, #tpu.memory_space<vmem>>, vector<16x32xf32>
    %c0_50 = arith.constant 0 : index
    %c0_51 = arith.constant 0 : index
    %65 = vector.load %arg2[%c0_50, %c0_51] : memref<32x128xf32, #tpu.memory_space<vmem>>, vector<32x128xf32>
    %cst = arith.constant dense<0.000000e+00> : vector<16x128xf32>
    %66 = tpu.matmul %64, %65, %cst {dimension_numbers = #tpu.dot_dimension_numbers<[1], [0], [0], [1], [0, 0, 1, 1], [], []>} : vector<16x32xf32>, vector<32x128xf32>, vector<16x128xf32> -> vector<16x128xf32>
    %67 = vector.extract_strided_slice %66 {offsets = [0, 0], sizes = [8, 32], strides = [1, 1]} : vector<16x128xf32> to vector<8x32xf32>
    %68 = vector.extract_strided_slice %66 {offsets = [0, 32], sizes = [8, 32], strides = [1, 1]} : vector<16x128xf32> to vector<8x32xf32>
    %69 = vector.extract_strided_slice %66 {offsets = [0, 64], sizes = [8, 32], strides = [1, 1]} : vector<16x128xf32> to vector<8x32xf32>
    %cst_52 = arith.constant dense<0.000000e+00> : vector<8x8xf32>
    %70 = tpu.matmul %67, %68, %cst_52 {dimension_numbers = #tpu.dot_dimension_numbers<[1], [1], [0], [0], [0, 0, 1, 0], [], []>} : vector<8x32xf32>, vector<8x32xf32>, vector<8x8xf32> -> vector<8x8xf32>
    %cst_53 = arith.constant dense<0xFF800000> : vector<8xf32>
    %71 = vector.multi_reduction <maximumf>, %70, %cst_53 [1] : vector<8x8xf32> to vector<8xf32>
    %72 = vector.shape_cast %71 : vector<8xf32> to vector<8x1xf32>
    %73 = vector.broadcast %72 : vector<8x1xf32> to vector<8x8xf32>
    %74 = arith.subf %70, %73 : vector<8x8xf32>
    %75 = math.exp %74 : vector<8x8xf32>
    %cst_54 = arith.constant dense<0.000000e+00> : vector<8xf32>
    %76 = vector.multi_reduction <add>, %75, %cst_54 [1] : vector<8x8xf32> to vector<8xf32>
    %77 = vector.shape_cast %76 : vector<8xf32> to vector<8x1xf32>
    %78 = vector.broadcast %77 : vector<8x1xf32> to vector<8x8xf32>
    %79 = arith.divf %75, %78 : vector<8x8xf32>
    %cst_55 = arith.constant dense<0.000000e+00> : vector<8x32xf32>
    %80 = tpu.matmul %79, %69, %cst_55 {dimension_numbers = #tpu.dot_dimension_numbers<[1], [0], [0], [1], [0, 0, 1, 1], [], []>} : vector<8x8xf32>, vector<8x32xf32>, vector<8x32xf32> -> vector<8x32xf32>
    %81 = vector.extract_strided_slice %66 {offsets = [8, 0], sizes = [8, 32], strides = [1, 1]} : vector<16x128xf32> to vector<8x32xf32>
    %82 = vector.extract_strided_slice %66 {offsets = [8, 32], sizes = [8, 32], strides = [1, 1]} : vector<16x128xf32> to vector<8x32xf32>
    %83 = vector.extract_strided_slice %66 {offsets = [8, 64], sizes = [8, 32], strides = [1, 1]} : vector<16x128xf32> to vector<8x32xf32>
    %cst_56 = arith.constant dense<0.000000e+00> : vector<8x8xf32>
    %84 = tpu.matmul %81, %82, %cst_56 {dimension_numbers = #tpu.dot_dimension_numbers<[1], [1], [0], [0], [0, 0, 1, 0], [], []>} : vector<8x32xf32>, vector<8x32xf32>, vector<8x8xf32> -> vector<8x8xf32>
    %cst_57 = arith.constant dense<0xFF800000> : vector<8xf32>
    %85 = vector.multi_reduction <maximumf>, %84, %cst_57 [1] : vector<8x8xf32> to vector<8xf32>
    %86 = vector.shape_cast %85 : vector<8xf32> to vector<8x1xf32>
    %87 = vector.broadcast %86 : vector<8x1xf32> to vector<8x8xf32>
    %88 = arith.subf %84, %87 : vector<8x8xf32>
    %89 = math.exp %88 : vector<8x8xf32>
    %cst_58 = arith.constant dense<0.000000e+00> : vector<8xf32>
    %90 = vector.multi_reduction <add>, %89, %cst_58 [1] : vector<8x8xf32> to vector<8xf32>
    %91 = vector.shape_cast %90 : vector<8xf32> to vector<8x1xf32>
    %92 = vector.broadcast %91 : vector<8x1xf32> to vector<8x8xf32>
    %93 = arith.divf %89, %92 : vector<8x8xf32>
    %cst_59 = arith.constant dense<0.000000e+00> : vector<8x32xf32>
    %94 = tpu.matmul %93, %83, %cst_59 {dimension_numbers = #tpu.dot_dimension_numbers<[1], [0], [0], [1], [0, 0, 1, 1], [], []>} : vector<8x8xf32>, vector<8x32xf32>, vector<8x32xf32> -> vector<8x32xf32>
    %95 = tpu.concatenate %80, %94 in 0 : vector<8x32xf32>, vector<8x32xf32> -> vector<16x32xf32>
    %c0_60 = arith.constant 0 : index
    %c0_61 = arith.constant 0 : index
    %96 = vector.load %arg3[%c0_60, %c0_61] : memref<2x32xf32, #tpu.memory_space<vmem>>, vector<2x32xf32>
    %97 = vector.extract_strided_slice %65 {offsets = [0, 96], sizes = [32, 32], strides = [1, 1]} : vector<32x128xf32> to vector<32x32xf32>
    %cst_62 = arith.constant dense<0.000000e+00> : vector<16x32xf32>
    %98 = tpu.matmul %95, %97, %cst_62 {dimension_numbers = #tpu.dot_dimension_numbers<[1], [0], [0], [1], [0, 0, 1, 1], [], []>} : vector<16x32xf32>, vector<32x32xf32>, vector<16x32xf32> -> vector<16x32xf32>
    %99 = vector.extract_strided_slice %96 {offsets = [0, 0], sizes = [1, 32], strides = [1, 1]} : vector<2x32xf32> to vector<1x32xf32>
    %100 = vector.broadcast %99 : vector<1x32xf32> to vector<16x32xf32>
    %101 = arith.addf %98, %100 : vector<16x32xf32>
    %cst_63 = arith.constant 0.000000e+00 : f32
    %102 = vector.broadcast %cst_63 : f32 to vector<16x32xf32>
    %103 = arith.maximumf %101, %102 : vector<16x32xf32>
    %104 = vector.extract_strided_slice %103 {offsets = [0, 0], sizes = [8, 32], strides = [1, 1]} : vector<16x32xf32> to vector<8x32xf32>
    %cst_64 = arith.constant dense<0.000000e+00> : vector<32xf32>
    %105 = vector.multi_reduction <add>, %104, %cst_64 [0] : vector<8x32xf32> to vector<32xf32>
    %106 = vector.shape_cast %105 : vector<32xf32> to vector<1x32xf32>
    %cst_65 = arith.constant 8.000000e+00 : f32
    %107 = vector.broadcast %cst_65 : f32 to vector<1x32xf32>
    %108 = arith.divf %106, %107 : vector<1x32xf32>
    %109 = vector.extract_strided_slice %103 {offsets = [8, 0], sizes = [8, 32], strides = [1, 1]} : vector<16x32xf32> to vector<8x32xf32>
    %cst_66 = arith.constant dense<0.000000e+00> : vector<32xf32>
    %110 = vector.multi_reduction <add>, %109, %cst_66 [0] : vector<8x32xf32> to vector<32xf32>
    %111 = vector.shape_cast %110 : vector<32xf32> to vector<1x32xf32>
    %cst_67 = arith.constant 8.000000e+00 : f32
    %112 = vector.broadcast %cst_67 : f32 to vector<1x32xf32>
    %113 = arith.divf %111, %112 : vector<1x32xf32>
    %114 = tpu.concatenate %108, %113 in 0 : vector<1x32xf32>, vector<1x32xf32> -> vector<2x32xf32>
    %115 = vector.extract_strided_slice %96 {offsets = [1, 0], sizes = [1, 32], strides = [1, 1]} : vector<2x32xf32> to vector<1x32xf32>
    %116 = vector.broadcast %115 : vector<1x32xf32> to vector<2x32xf32>
    %117 = arith.mulf %114, %116 : vector<2x32xf32>
    %cst_68 = arith.constant dense<0.000000e+00> : vector<2xf32>
    %118 = vector.multi_reduction <add>, %117, %cst_68 [1] : vector<2x32xf32> to vector<2xf32>
    %119 = vector.shape_cast %118 : vector<2xf32> to vector<2x1xf32>
    %c0_69 = arith.constant 0 : index
    %c0_70 = arith.constant 0 : index
    %120 = memref.load %arg4[%c0_69, %c0_70] : memref<1x1xf32, #tpu.memory_space<smem>>
    %121 = vector.broadcast %120 : f32 to vector<2x1xf32>
    %122 = arith.addf %119, %121 : vector<2x1xf32>
    %cst_71 = arith.constant 0.000000e+00 : f32
    %123 = vector.broadcast %cst_71 : f32 to vector<2x1xf32>
    %124 = arith.subf %123, %122 : vector<2x1xf32>
    %125 = math.exp %124 : vector<2x1xf32>
    %cst_72 = arith.constant 1.000000e+00 : f32
    %126 = vector.broadcast %cst_72 : f32 to vector<2x1xf32>
    %127 = arith.addf %126, %125 : vector<2x1xf32>
    %cst_73 = arith.constant 1.000000e+00 : f32
    %128 = vector.broadcast %cst_73 : f32 to vector<2x1xf32>
    %129 = arith.divf %128, %127 : vector<2x1xf32>
    %c0_74 = arith.constant 0 : index
    %c0_75 = arith.constant 0 : index
    %130 = vector.load %arg5[%c0_74, %c0_75] : memref<2x1xf32, #tpu.memory_space<vmem>>, vector<2x1xf32>
    tpu.vector_store %arg5[%c0_74, %c0_75], %129 {strides = array<i32>} : memref<2x1xf32, #tpu.memory_space<vmem>>, vector<2x1xf32>,
    return
  }
}

</mosaic_0001>

<bundles_post_ra>
// kernel: basic_transformer_forward.1
= control target key start
LH: loop header
LB: loop body
LE: loop exit
PB: predicated region body
PF: predicated region fallthrough
CT: control target
= control target key end

     0   :  { %11 = vsyncpa [#allocation6], 0  ;;  %s993_s0 = inlined_call_operand.vmem [shape: s32[16], index: 0, kind: input, shape index: {}]   ;;  %s994_s1 = inlined_call_operand.hbm [shape: f32[24,32], index: 1, kind: input, shape index: {}]   ;;  %s995_s2 = inlined_call_operand.hbm [shape: f32[32,128], index: 2, kind: input, shape index: {}]   ;;  %s996_s3 = inlined_call_operand.vmem [shape: f32[2,32], index: 3, kind: input, shape index: {}]   ;;  %s997_s4 = inlined_call_operand.<no memory space> [shape: f32[1,1], index: 4, kind: input, shape index: {}]   ;;  %s998_s5 = inlined_call_operand.vmem [shape: f32[2,1], index: 5, kind: output, shape index: {}]  }
   0x1   :  { %12 = vsyncpa [#allocation5], 0  ;;  %s20_s20 = sshll.u32 %s993_s0, 4  ;;  %s21_s20 = int_to_ptr.vmem [resolvable:$true] %s20_s20 }
   0x2   :  { %13 = vsyncpa [#allocation9], 0  ;;  %s819_s21 = scalar_lea.vmem %s21_s20, 16  ;;  %p824_p1 = scmp.lt.s32.totalorder %s21_s20, %s21_s20 }
   0x3   :  { %p820_p0 = scmp.ne.s32.totalorder %s21_s20, %s819_s21  ;;  %p825_p2 = scmp.lt.s32.totalorder %s819_s21, %s819_s21 }
   0x5   :  { %p826_p3 = por %p825_p2, %p824_p1 }
   0x7   :  { %p827_p4 = pnand %p826_p3, %p820_p0 }
   0x9   :  { %830 = shalt.err (!%p827_p4)
}
   0xa   :  { %s877_s22 = smov [#allocation4]   ;;  %s878_s23 = smov [#allocation7]  }
   0xb   :  { %23 = dma.vmem_to_smem %s21_s20, 16, %s877_s22, [#allocation6]  }
   0xc   :  { %s29_s24 = sshll.u32 %s878_s23, 4  ;;  %s30_s24 = int_to_ptr.vmem [resolvable:$true] %s29_s24 }
   0xd   :  { %s839_s25 = scalar_lea.vmem %s30_s24, 384  ;;  %p844_p6 = scmp.lt.s32.totalorder %s30_s24, %s30_s24 }
   0xe   :  { %p840_p5 = scmp.ne.s32.totalorder %s30_s24, %s839_s25  ;;  %p845_p7 = scmp.lt.s32.totalorder %s839_s25, %s839_s25 }
  0x10   :  { %p846_p8 = por %p845_p7, %p844_p6 }
  0x12   :  { %p847_p9 = pnand %p846_p8, %p840_p5 }
  0x14   :  { %850 = shalt.err (!%p847_p9)
}
  0x15   :  { %s879_s0 = smov 128   ;;  %s880_s26 = smov 8  }
  0x16   :  { %35 = dma.hbm_to_vmem [thread:$0]  %s994_s1, 384, %s30_s24, [#allocation5], %s879_s0, %s879_s0, %s880_s26  }
  0x17   :  { %s881_s29 = smov [#allocation8]  }
  0x18   :  { %s41_s30 = sshll.u32 %s881_s29, 4  ;;  %s42_s30 = int_to_ptr.vmem [resolvable:$true] %s41_s30 }
  0x19   :  { %s859_s6 = scalar_lea.vmem %s42_s30, 512  ;;  %p864_p11 = scmp.lt.s32.totalorder %s42_s30, %s42_s30 }
  0x1a   :  { %p860_p10 = scmp.ne.s32.totalorder %s42_s30, %s859_s6  ;;  %p865_p12 = scmp.lt.s32.totalorder %s859_s6, %s859_s6 }
  0x1c   :  { %p866_p13 = por %p865_p12, %p864_p11 }
  0x1e   :  { %p867_p0 = pnand %p866_p13, %p860_p10 }
  0x20   :  { %870 = shalt.err (!%p867_p0)
}
  0x21   :  { %47 = dma.hbm_to_vmem [thread:$0]  %s995_s2, 512, %s42_s30, [#allocation9], %s879_s0, %s879_s0, %s880_s26  }
  0x22   :  { %871 = dma.done.wait [#allocation6], 16  }
  0x23   :  { %872 = vsyncadd [#allocation6], 4294967280 }
  0x24   :  { %873 = dma.done.wait [#allocation5], 384  }
  0x25   :  { %874 = vsyncadd [#allocation5], 4294966912 }
  0x26   :  { %875 = dma.done.wait [#allocation9], 512  }
  0x27   :  { %876 = vsyncadd [#allocation9], 4294966784 }
  0x28   :  { %61 = sfence }
  0x29   :  { %v926_v0 = vld [vmem:[#allocation8 + $0x18] sm:$0xff]  ;;  %v928_v1 = vld [vmem:[#allocation8 + $0x10] sm:$0xff]  ;;  %s62_s1 = sld [smem:[#allocation4]]  ;;  %v932_v2 = vld [vmem:[#allocation8 + $0x8] sm:$0xff]  ;;  %vm65_vm0 = vcmask 253952   ;;  %vm133_vm1 = vcmask 261120   ;;  %v545_v59 = vlaneseq }
  0x2a   :  { %755 = vmatprep.subr.mxu0 %v926_v0  ;;  %s710_s9 = sld [smem:[#allocation4 + $0x1]]  ;;  %v936_v3 = vld [vmem:[#allocation8] sm:$0xff]  ;;  %v882_v22 = vmov 0.0   ;;  %vm883_vm2 = vmmov 0   ;;  %vm292_vm3 = vcmask 64512   ;;  %vm665_vm4 = vcmask 1040384  }
  0x2b   :  { %756 = vmatpush3.msra.mxu0 %v926_v0  ;;  %s711_s2 = sld [smem:[#allocation4 + $0x2]]  ;;  %766 = vmatprep.subr.mxu1 %v882_v22  ;;  %v546_v60 = vshrl.u32 %v545_v59, 7  ;;  %v544_v62 = vld [vmem:[%s996_s3] sm:$0x3]  ;;  %vm672_vm5 = vcmask 254976   ;;  %vm685_vm6 = vcmask 1024  }
  0x2c   :  { %757 = vmatprep.subr.mxu0 %v928_v1  ;;  %s712_s10 = sld [smem:[#allocation4 + $0x3]]  ;;  %768 = vmatprep.mubr.msk.f32.mxu1 %vm883_vm2, %v882_v22 }
  0x2d   :  { %758 = vmatpush3.msra.mxu0 %v928_v1  ;;  %s713_s11 = sld [smem:[#allocation4 + $0x4]]  ;;  %v547_v61 = vsub.s32 0, %v546_v60 }
  0x2e   :  { %759 = vmatprep.subr.mxu0 %v932_v2  ;;  %s714_s12 = sld [smem:[#allocation4 + $0x5]] }
  0x2f   :  { %760 = vmatpush3.msra.mxu0 %v932_v2  ;;  %s715_s13 = sld [smem:[#allocation4 + $0x6]]  ;;  %s63_s14 = scalar_lea.vmem [#allocation7], %s62_s1  ;;  %v548_v63 = vrot.slane %v544_v62, %v547_v61 }
  0x30   :  { %761 = vmatprep.subr.mxu0 %v936_v3  ;;  %v64_v4 = vld [vmem:[%s63_s14] sm:$0x1]  ;;  %s716_s15 = sld [smem:[#allocation4 + $0x7]]  ;;  %s68_s16 = scalar_lea.vmem [#allocation7], %s710_s9 }
  0x31   :  { %762 = vmatpush3.msra.mxu0 %v936_v3  ;;  %66 = vst.msk [vmem:[#allocation2] sm:$0x1] %vm65_vm0, %v64_v4  ;;  %v69_v5 = vld [vmem:[%s68_s16] sm:$0x1]  ;;  %s717_s17 = sld [smem:[#allocation4 + $0x8]]  ;;  %s72_s18 = scalar_lea.vmem [#allocation7], %s711_s2 }
  0x32   :  { %70 = vst.msk [vmem:[#allocation2 + $0x1] sm:$0x1] %vm65_vm0, %v69_v5  ;;  %v73_v6 = vld [vmem:[%s72_s18] sm:$0x1]  ;;  %s718_s19 = sld [smem:[#allocation4 + $0x9]]  ;;  %s76_s20 = scalar_lea.vmem [#allocation7], %s712_s10 }
  0x33   :  { %74 = vst.msk [vmem:[#allocation2 + $0x2] sm:$0x1] %vm65_vm0, %v73_v6  ;;  %v77_v7 = vld [vmem:[%s76_s20] sm:$0x1]  ;;  %s719_s21 = sld [smem:[#allocation4 + $0xa]]  ;;  %s80_s22 = scalar_lea.vmem [#allocation7], %s713_s11 }
  0x34   :  { %78 = vst.msk [vmem:[#allocation2 + $0x3] sm:$0x1] %vm65_vm0, %v77_v7  ;;  %v81_v8 = vld [vmem:[%s80_s22] sm:$0x1]  ;;  %s720_s23 = sld [smem:[#allocation4 + $0xb]]  ;;  %s84_s24 = scalar_lea.vmem [#allocation7], %s714_s12 }
  0x35   :  { %82 = vst.msk [vmem:[#allocation2 + $0x4] sm:$0x1] %vm65_vm0, %v81_v8  ;;  %v85_v9 = vld [vmem:[%s84_s24] sm:$0x1]  ;;  %s721_s25 = sld [smem:[#allocation4 + $0xc]]  ;;  %s88_s0 = scalar_lea.vmem [#allocation7], %s715_s13 }
  0x36   :  { %86 = vst.msk [vmem:[#allocation2 + $0x5] sm:$0x1] %vm65_vm0, %v85_v9  ;;  %v89_v10 = vld [vmem:[%s88_s0] sm:$0x1]  ;;  %s722_s26 = sld [smem:[#allocation4 + $0xd]]  ;;  %s92_s27 = scalar_lea.vmem [#allocation7], %s716_s15 }
  0x37   :  { %90 = vst.msk [vmem:[#allocation2 + $0x6] sm:$0x1] %vm65_vm0, %v89_v10  ;;  %v93_v11 = vld [vmem:[%s92_s27] sm:$0x1]  ;;  %s723_s28 = sld [smem:[#allocation4 + $0xe]]  ;;  %s96_s29 = scalar_lea.vmem [#allocation7], %s717_s17 }
  0x38   :  { %94 = vst.msk [vmem:[#allocation2 + $0x7] sm:$0x1] %vm65_vm0, %v93_v11  ;;  %v97_v12 = vld [vmem:[%s96_s29] sm:$0x1]  ;;  %s724_s30 = sld [smem:[#allocation4 + $0xf]]  ;;  %s100_s6 = scalar_lea.vmem [#allocation7], %s718_s19 }
  0x39   :  { %98 = vst.msk [vmem:[#allocation2 + $0x8] sm:$0x1] %vm65_vm0, %v97_v12  ;;  %v101_v13 = vld [vmem:[%s100_s6] sm:$0x1]  ;;  %s104_s7 = scalar_lea.vmem [#allocation7], %s719_s21  ;;  %s884_s11 = smov 64  }
  0x3a   :  { %102 = vst.msk [vmem:[#allocation2 + $0x9] sm:$0x1] %vm65_vm0, %v101_v13  ;;  %v105_v14 = vld [vmem:[%s104_s7] sm:$0x1]  ;;  %s108_s8 = scalar_lea.vmem [#allocation7], %s720_s23  ;;  %s885_s12 = smov 96  }
  0x3b   :  { %106 = vst.msk [vmem:[#allocation2 + $0xa] sm:$0x1] %vm65_vm0, %v105_v14  ;;  %v109_v15 = vld [vmem:[%s108_s8] sm:$0x1]  ;;  %s112_s1 = scalar_lea.vmem [#allocation7], %s721_s25  ;;  %s886_s13 = smov 32  }
  0x3c   :  { %110 = vst.msk [vmem:[#allocation2 + $0xb] sm:$0x1] %vm65_vm0, %v109_v15  ;;  %v113_v16 = vld [vmem:[%s112_s1] sm:$0x1]  ;;  %s116_s9 = scalar_lea.vmem [#allocation7], %s722_s26 }
  0x3d   :  { %114 = vst.msk [vmem:[#allocation2 + $0xc] sm:$0x1] %vm65_vm0, %v113_v16  ;;  %v117_v17 = vld [vmem:[%s116_s9] sm:$0x1]  ;;  %s120_s2 = scalar_lea.vmem [#allocation7], %s723_s28 }
  0x3e   :  { %118 = vst.msk [vmem:[#allocation2 + $0xd] sm:$0x1] %vm65_vm0, %v117_v17  ;;  %v121_v18 = vld [vmem:[%s120_s2] sm:$0x1]  ;;  %s124_s10 = scalar_lea.vmem [#allocation7], %s724_s30  ;;  %v669_v17 = vsub.s32 1, %v546_v60 }
  0x3f   :  { %v127_v19 = vld [vmem:[#allocation2] sm:$0xff]  ;;  %122 = vst.msk [vmem:[#allocation2 + $0xe] sm:$0x1] %vm65_vm0, %v121_v18 }
  0x40   :  { %v125_v20 = vld [vmem:[%s124_s10] sm:$0x1]  ;;  %763 = vmatprep.mubr.msk.f32.mxu0 %vm133_vm1, %v127_v19 }
  0x41   :  { %126 = vst.msk [vmem:[#allocation2 + $0xf] sm:$0x1] %vm65_vm0, %v125_v20 }
  0x48   :  { %v128_v21 = vld [vmem:[#allocation2 + $0x8] sm:$0xff] }
  0x49   :  { %764 = vmatmul.mubr.msk.f32.vlgmr.msra.gmra.mxu0 %vm133_vm1, %v128_v21  ;;  %v670_v21 = vrot.slane %v544_v62, %v669_v17 }
 0x109   :  { %v765_v23 = vpop.f32.mrf.mxu0 }
 0x10b   :  { %v206_v24 = vpop.f32.mrf.mxu0 }
 0x10c   :  { %304 = vrot.lane.b32.xlu1 %v206_v24, %s884_s11  ;;  %216 = vrot.lane.b32.xlu0 %v206_v24, %s885_s12 }
 0x17e   :  { %v217_v25 = vpop.permute.xlu0 %216  ;;  %v305_v26 = vpop.permute.xlu1 %304 }
 0x17f   :  { %767 = vmatpush3.xpose.msk.msra.mxu1 %vm133_vm1, %v217_v25 }
 0x180   :  { %771 = vmatprep.subr.mxu1 %v882_v22 }
 0x182   :  { %769 = vmatmul.mubr.msk.f32.vlgmr.msra.gmra.mxu1 %vm133_vm1, %v206_v24 }
 0x183   :  { %772 = vmatpush3.msra.mxu1 %v305_v26  ;;  %773 = vmatprep.mubr.msk.f32.mxu1 %vm883_vm2, %v882_v22 }
 0x184   :  { %776 = vmatprep.subr.mxu1 %v882_v22 }
 0x242   :  { %v288_v27 = vpop.f32.mrf.mxu1 }
 0x243   :  { %v293_v28 = vsel %vm292_vm3, %v288_v27, -inf }
 0x244   :  { %294 = vmax.xlane.f32.xlu0 %v293_v28  ;;  %v770_v29 = vpop.f32.mrf.mxu1 }
 0x2cd   :  { %v295_v30 = vpop.xlane.xlu0 %294 }
 0x2ce   :  { %v296_v31 = vsub.f32 %v288_v27, %v295_v30  ;;  %v677_v27 = vstv %s997_s4 }
 0x2d0   :  { %v297_v32 = vmul.f32 1.442695, %v296_v31 }
 0x2d2   :  { %807 = vpow2.f32 %v297_v32 }
 0x2df   :  { %v808_v33 = vpop.eup %807 }
 0x2e0   :  { %v299_v34 = vsel %vm292_vm3, %v808_v33, 0.0 }
 0x2e1   :  { %300 = vadd.xlane.f32.xlu1 %v299_v34 }
 0x2f2   :  { %381 = vrot.lane.b32.xlu1 %v765_v23, %s885_s12 }
 0x36a   :  { %v301_v35 = vpop.xlane.xlu1 %300 }
 0x36b   :  { %809 = vrcp.f32 %v301_v35 }
 0x36e   :  { %v382_v38 = vpop.permute.xlu1 %381 }
 0x378   :  { %v810_v36 = vpop.eup %809 }
 0x379   :  { %v303_v37 = vmul.f32 %v810_v36, %v808_v33 }
 0x37b   :  { %774 = vmatmul.mubr.msk.f32.vlgmr.msra.gmra.mxu1 %vm292_vm3, %v303_v37 }
 0x37c   :  { %777 = vmatpush3.xpose.msk.msra.mxu1 %vm133_vm1, %v382_v38  ;;  %778 = vmatprep.mubr.msk.f32.mxu1 %vm883_vm2, %v882_v22 }
 0x37d   :  { %781 = vmatprep.subr.mxu1 %v882_v22 }
 0x37f   :  { %779 = vmatmul.mubr.msk.f32.vlgmr.msra.gmra.mxu1 %vm133_vm1, %v765_v23 }
 0x380   :  { %783 = vmatprep.mubr.msk.f32.mxu1 %vm883_vm2, %v882_v22 }
 0x43b   :  { %v376_v39 = vpop.f32.mrf.mxu1 }
 0x43c   :  { %794 = vmatprep.mubr.msk.f32.mxu0 %vm133_vm1, %v376_v39 }
 0x43d   :  { %v775_v40 = vpop.f32.mrf.mxu1 }
 0x43f   :  { %v453_v41 = vpop.f32.mrf.mxu1 }
 0x440   :  { %v457_v42 = vsel %vm292_vm3, %v453_v41, -inf }
 0x441   :  { %458 = vmax.xlane.f32.xlu1 %v457_v42  ;;  %v780_v43 = vpop.f32.mrf.mxu1 }
 0x452   :  { %557 = vrot.lane.b32.xlu1 %v928_v1, %s886_s13 }
 0x4ca   :  { %v459_v44 = vpop.xlane.xlu1 %458 }
 0x4cb   :  { %v460_v45 = vsub.f32 %v453_v41, %v459_v44 }
 0x4cd   :  { %v461_v46 = vmul.f32 1.442695, %v460_v45 }
 0x4ce   :  { %v558_v52 = vpop.permute.xlu1 %557 }
 0x4cf   :  { %811 = vpow2.f32 %v461_v46 }
 0x4dc   :  { %v812_v47 = vpop.eup %811 }
 0x4dd   :  { %v463_v48 = vsel %vm292_vm3, %v812_v47, 0.0 }
 0x4de   :  { %464 = vadd.xlane.f32.xlu0 %v463_v48 }
 0x4f4   :  { %468 = vrot.lane.b32.xlu0 %v765_v23, %s884_s11 }
 0x4f8   :  { %559 = vrot.lane.b32.xlu0 %v926_v0, %s886_s13 }
 0x4fc   :  { %555 = vrot.lane.b32.xlu0 %v932_v2, %s886_s13 }
 0x500   :  { %553 = vrot.lane.b32.xlu0 %v936_v3, %s886_s13 }
 0x567   :  { %v465_v49 = vpop.xlane.xlu0 %464 }
 0x568   :  { %813 = vrcp.f32 %v465_v49 }
 0x56b   :  { %v469_v50 = vpop.permute.xlu0 %468 }
 0x56c   :  { %782 = vmatpush3.msra.mxu1 %v469_v50 }
 0x56f   :  { %v560_v51 = vpop.permute.xlu0 %559 }
 0x570   :  { %786 = vmatprep.subr.mxu0 %v560_v51 }
 0x571   :  { %787 = vmatpush3.msra.mxu0 %v560_v51 }
 0x572   :  { %788 = vmatprep.subr.mxu0 %v558_v52 }
 0x573   :  { %v556_v53 = vpop.permute.xlu0 %555  ;;  %789 = vmatpush3.msra.mxu0 %v558_v52 }
 0x574   :  { %790 = vmatprep.subr.mxu0 %v556_v53 }
 0x575   :  { %v814_v54 = vpop.eup %813  ;;  %791 = vmatpush3.msra.mxu0 %v556_v53 }
 0x576   :  { %v467_v55 = vmul.f32 %v814_v54, %v812_v47 }
 0x577   :  { %v554_v56 = vpop.permute.xlu0 %553 }
 0x578   :  { %784 = vmatmul.mubr.msk.f32.vlgmr.msra.gmra.mxu1 %vm292_vm3, %v467_v55  ;;  %792 = vmatprep.subr.mxu0 %v554_v56 }
 0x579   :  { %793 = vmatpush3.msra.mxu0 %v554_v56 }
 0x638   :  { %v540_v57 = vpop.f32.mrf.mxu1 }
 0x639   :  { %795 = vmatmul.mubr.msk.f32.vlgmr.msra.gmra.mxu0 %vm133_vm1, %v540_v57 }
 0x63a   :  { %v785_v58 = vpop.f32.mrf.mxu1 }
 0x6f9   :  { %v796_v0 = vpop.f32.mrf.mxu0 }
 0x6fa   :  { %v643_v1 = vadd.f32 %v796_v0, %v548_v63 }
 0x6fb   :  { %v637_v2 = vpop.f32.mrf.mxu0 }
 0x6fc   :  { %v647_v3 = vmax.f32 %v643_v1, 0.0  ;;  %v638_v4 = vadd.f32 %v637_v2, %v548_v63 }
 0x6fe   :  { %v657_v5 = vsel %vm133_vm1, %v647_v3, 0.0  ;;  %v646_v6 = vmax.f32 %v638_v4, 0.0 }
 0x6ff   :  { %v658_v7 = vrot.slane %v657_v5, 4 }
 0x700   :  { %v648_v8 = vsel %vm133_vm1, %v646_v6, 0.0 }
 0x701   :  { %v659_v9 = vadd.f32 %v658_v7, %v657_v5  ;;  %v649_v10 = vrot.slane %v648_v8, 4 }
 0x703   :  { %v660_v11 = vrot.slane %v659_v9, 2  ;;  %v650_v12 = vadd.f32 %v649_v10, %v648_v8 }
 0x705   :  { %v661_v13 = vadd.f32 %v660_v11, %v659_v9  ;;  %v651_v14 = vrot.slane %v650_v12, 2 }
 0x707   :  { %v662_v15 = vrot.slane %v661_v13, 1  ;;  %v652_v16 = vadd.f32 %v651_v14, %v650_v12 }
 0x709   :  { %v663_v18 = vadd.f32 %v662_v15, %v661_v13  ;;  %v653_v19 = vrot.slane %v652_v16, 1 }
 0x70b   :  { %v654_v20 = vadd.f32 %v653_v19, %v652_v16  ;;  %v664_v23 = vmul.f32 0.125, %v663_v18 }
 0x70d   :  { %v656_v22 = vmul.f32 0.125, %v654_v20 }
 0x70f   :  { %v666_v24 = vsel %vm665_vm4, %v656_v22, %v664_v23 }
 0x710   :  { %v671_v25 = vmul.f32 %v670_v21, %v666_v24 }
 0x712   :  { %v673_v26 = vsel %vm672_vm5, %v671_v25, 0.0 }
 0x713   :  { %674 = vadd.xlane.f32.xlu0 %v673_v26 }
 0x79c   :  { %v675_v28 = vpop.xlane.xlu0 %674 }
 0x79d   :  { %v678_v29 = vadd.f32 %v677_v27, %v675_v28 }
 0x79f   :  { %v679_v30 = vsub.f32 0.0, %v678_v29 }
 0x7a1   :  { %v680_v31 = vmul.f32 1.442695, %v679_v30 }
 0x7a3   :  { %815 = vpow2.f32 %v680_v31 }
 0x7b0   :  { %v816_v32 = vpop.eup %815 }
 0x7b1   :  { %v682_v33 = vadd.f32 1.0, %v816_v32 }
 0x7b3   :  { %817 = vrcp.f32 %v682_v33 }
 0x7c0   :  { %v818_v34 = vpop.eup %817 }
 0x7c1   :  { %686 = vst.msk [vmem:[%s998_s5] sm:$0x3] %vm685_vm6, %v818_v34 }
 0x7c2   :  { %691 = vsyncpa [#allocation5], 1 }
 0x7c3   :  { %692 = vsyncpa [#allocation9], 1 }
 0x7c4   :  { %693 = vsyncpa [#allocation6], 1 }

</bundles_post_ra>
